<compile_context>
chip_gen: v5e
topology: v5e:2x2
jax: 0.10.0
libtpu: 0.0.40
codegen_flags: <defaults>
</compile_context>

<pallas_src>
import jax
import jax.numpy as jnp
from jax.experimental import pallas as pl
from jax.experimental.pallas import tpu as pltpu

EPS = 1e-5
NEG_SLOPE = 0.2

# Row indices inside the packed (8, 256) f32 parameter slab.
P_G1, P_BE1, P_G2, P_BE2, P_W3, P_B3 = 0, 1, 2, 3, 4, 5


def _bn_leaky(h, gamma, beta):
    """Training-mode BatchNorm1d (biased batch variance, centered two-pass) folded
    into one FMA per element, followed by LeakyReLU(0.2). h: (B, N) float32."""
    m1 = jnp.mean(h, axis=0, keepdims=True)          # (1, N)  sublane reduction (XLU)
    hc = h - m1                                       # centered activations (reused)
    var = jnp.mean(hc * hc, axis=0, keepdims=True)    # biased batch variance, stable
    scale = gamma * jax.lax.rsqrt(var + EPS)          # (1, N)  rsqrt -> EUP slot
    y = hc * scale + beta                             # one FMA per element
    return jnp.maximum(y, NEG_SLOPE * y)              # LeakyReLU(0.2), 2 VALU ops


def model_dx_kernel(
    x_ref,        # (B, D)    f32  (cast to bf16 in-kernel)
    w1_ref,       # (D, 256)  bf16
    w2_ref,       # (256,128) bf16
    pslab_ref,    # (8, 256)  f32  packed: g1|be1|g2|be2|w3|b3
    out_ref,      # (B, 1)    f32
):
    p = pslab_ref[...]                                # one load, 2 vregs

    # ---- Linear1 (bias cancelled by training-mode BN) + BN1 + LeakyReLU ----
    x = x_ref[...].astype(jnp.bfloat16)               # cast hides under the matmul
    h1 = jnp.dot(x, w1_ref[...], preferred_element_type=jnp.float32)
    h1 = _bn_leaky(h1, p[P_G1:P_G1 + 1, :], p[P_BE1:P_BE1 + 1, :])

    # ---- Linear2 (bias cancelled by BN) + BN2 + LeakyReLU ----
    h2 = jnp.dot(h1.astype(jnp.bfloat16), w2_ref[...],
                 preferred_element_type=jnp.float32)
    h2 = _bn_leaky(h2, p[P_G2:P_G2 + 1, 0:128], p[P_BE2:P_BE2 + 1, 0:128])

    # ---- Linear3 (out_features=1): VPU multiply + lane reduction, skip the MXU ----
    h3 = (jnp.sum(h2 * p[P_W3:P_W3 + 1, 0:128], axis=-1, keepdims=True)
          + p[P_B3:P_B3 + 1, 0:1])
    out_ref[...] = jax.nn.sigmoid(h3)


def model_dx_forward(feature, params):
    """Kernel wrapper. No per-call casting / packing: params are kernel-ready."""
    B = feature.shape[0]
    args = (feature, params["w1"], params["w2"], params["pslab"])
    return pl.pallas_call(
        model_dx_kernel,
        out_shape=jax.ShapeDtypeStruct((B, 1), jnp.float32),
        in_specs=[pl.BlockSpec(memory_space=pltpu.VMEM) for _ in args],
        out_specs=pl.BlockSpec(memory_space=pltpu.VMEM),
    )(*args)


def model_dx_reference(feature, params):
    """Pure-JAX f32 reference of the PyTorch forward (includes the b1/b2 biases)."""
    def bn(h, g, b):
        mean = jnp.mean(h, axis=0, keepdims=True)
        var = jnp.mean((h - mean) ** 2, axis=0, keepdims=True)
        return (h - mean) * jax.lax.rsqrt(var + EPS) * g + b

    h = feature @ params["w1_f32"] + params["b1"]
    h = bn(h, params["g1"], params["be1"])
    h = jnp.where(h >= 0, h, NEG_SLOPE * h)
    h = h @ params["w2_f32"] + params["b2"]
    h = bn(h, params["g2"], params["be2"])
    h = jnp.where(h >= 0, h, NEG_SLOPE * h)
    h = h @ params["w3"].T + params["b3"]
    return jax.nn.sigmoid(h)


def init_params(key, input_size):
    """Deterministic init mimicking nn.Linear (uniform) + BatchNorm (ones/zeros).
    Kernel-ready tensors (bf16 weights, packed f32 slab) are built ONCE here so the
    per-call wrapper does zero data preparation."""
    ks = jax.random.split(key, 6)

    def linear_init(kw, kb, fan_in, fan_out):
        bound = 1.0 / jnp.sqrt(fan_in)
        w = jax.random.uniform(kw, (fan_in, fan_out), jnp.float32, -bound, bound)
        b = jax.random.uniform(kb, (1, fan_out), jnp.float32, -bound, bound)
        return w, b

    w1, b1 = linear_init(ks[0], ks[1], input_size, 256)
    w2, b2 = linear_init(ks[2], ks[3], 256, 128)
    w3, b3 = linear_init(ks[4], ks[5], 128, 1)

    g1 = jnp.ones((1, 256), jnp.float32)
    be1 = jnp.zeros((1, 256), jnp.float32)
    g2 = jnp.ones((1, 128), jnp.float32)
    be2 = jnp.zeros((1, 128), jnp.float32)

    # Packed (8, 256) f32 slab, (8,128)-aligned -> one DMA for all small params.
    pslab = jnp.zeros((8, 256), jnp.float32)
    pslab = pslab.at[P_G1, :].set(g1[0])
    pslab = pslab.at[P_BE1, :].set(be1[0])
    pslab = pslab.at[P_G2, :128].set(g2[0])
    pslab = pslab.at[P_BE2, :128].set(be2[0])
    pslab = pslab.at[P_W3, :128].set(w3.reshape(128))     # row-vector of Linear3 weight
    pslab = pslab.at[P_B3, 0].set(b3[0, 0])

    return {
        # kernel-ready (no per-call casts)
        "w1": w1.astype(jnp.bfloat16),
        "w2": w2.astype(jnp.bfloat16),
        "pslab": pslab,
        # f32 originals for the pure-JAX reference (b1/b2 only used there; inside the
        # kernel they are exactly cancelled by training-mode BatchNorm mean removal)
        "w1_f32": w1, "b1": b1, "g1": g1, "be1": be1,
        "w2_f32": w2, "b2": b2, "g2": g2, "be2": be2,
        "w3": w3.T.reshape(1, 128), "b3": b3.reshape(1, 1),
    }


if __name__ == "__main__":
    key = jax.random.PRNGKey(0)
    k_param, k_x = jax.random.split(key)

    input_size = 32
    batch = 16  # BatchNorm1d (training mode) needs batch > 1

    params = init_params(k_param, input_size)
    feature = jax.random.normal(k_x, (batch, input_size), jnp.float32)

    out = jax.block_until_ready(model_dx_forward(feature, params))
    ref = model_dx_reference(feature, params)

    assert out.shape == (batch, 1)
    assert bool(jnp.all(jnp.isfinite(out)))
    assert bool(jnp.all((out >= 0.0) & (out <= 1.0)))
    # bf16 matmul operands (x/w1/h1/w2) vs. f32 reference -> loose-but-meaningful tol.
    assert bool(jnp.allclose(out, ref, atol=5e-2, rtol=5e-2)), \
        float(jnp.max(jnp.abs(out - ref)))
    print("KERNEL_OK")
</pallas_src>

<mosaic_0001>
module attributes {stable_mosaic.version = 11 : i64} {
  func.func @model_dx_kernel(%arg0: memref<16x32xf32, #tpu.memory_space<vmem>>, %arg1: memref<32x256xbf16, #tpu.memory_space<vmem>>, %arg2: memref<256x128xbf16, #tpu.memory_space<vmem>>, %arg3: memref<8x256xf32, #tpu.memory_space<vmem>>, %arg4: memref<16x1xf32, #tpu.memory_space<vmem>>) attributes {dimension_semantics = [], scalar_prefetch = 0 : i64, scratch_operands = 0 : i64, tpu.core_type = #tpu.core_type<tc>} {
    %c0 = arith.constant 0 : index
    %c0_0 = arith.constant 0 : index
    %0 = vector.load %arg3[%c0, %c0_0] : memref<8x256xf32, #tpu.memory_space<vmem>>, vector<8x256xf32>
    %c0_1 = arith.constant 0 : index
    %c0_2 = arith.constant 0 : index
    %1 = vector.load %arg0[%c0_1, %c0_2] : memref<16x32xf32, #tpu.memory_space<vmem>>, vector<16x32xf32>
    %2 = arith.truncf %1 : vector<16x32xf32> to vector<16x32xbf16>
    %c0_3 = arith.constant 0 : index
    %c0_4 = arith.constant 0 : index
    %3 = vector.load %arg1[%c0_3, %c0_4] : memref<32x256xbf16, #tpu.memory_space<vmem>>, vector<32x256xbf16>
    %cst = arith.constant dense<0.000000e+00> : vector<16x256xf32>
    %4 = tpu.matmul %2, %3, %cst {dimension_numbers = #tpu.dot_dimension_numbers<[1], [0], [0], [1], [0, 0, 1, 1], [], []>} : vector<16x32xbf16>, vector<32x256xbf16>, vector<16x256xf32> -> vector<16x256xf32>
    %5 = vector.extract_strided_slice %0 {offsets = [0, 0], sizes = [1, 256], strides = [1, 1]} : vector<8x256xf32> to vector<1x256xf32>
    %6 = vector.extract_strided_slice %0 {offsets = [1, 0], sizes = [1, 256], strides = [1, 1]} : vector<8x256xf32> to vector<1x256xf32>
    %cst_5 = arith.constant dense<0.000000e+00> : vector<256xf32>
    %7 = vector.multi_reduction <add>, %4, %cst_5 [0] : vector<16x256xf32> to vector<256xf32>
    %8 = vector.shape_cast %7 : vector<256xf32> to vector<1x256xf32>
    %cst_6 = arith.constant 1.600000e+01 : f32
    %9 = vector.broadcast %cst_6 : f32 to vector<1x256xf32>
    %10 = arith.divf %8, %9 : vector<1x256xf32>
    %11 = vector.broadcast %10 : vector<1x256xf32> to vector<16x256xf32>
    %12 = arith.subf %4, %11 : vector<16x256xf32>
    %13 = arith.mulf %12, %12 : vector<16x256xf32>
    %cst_7 = arith.constant dense<0.000000e+00> : vector<256xf32>
    %14 = vector.multi_reduction <add>, %13, %cst_7 [0] : vector<16x256xf32> to vector<256xf32>
    %15 = vector.shape_cast %14 : vector<256xf32> to vector<1x256xf32>
    %cst_8 = arith.constant 1.600000e+01 : f32
    %16 = vector.broadcast %cst_8 : f32 to vector<1x256xf32>
    %17 = arith.divf %15, %16 : vector<1x256xf32>
    %cst_9 = arith.constant 9.99999974E-6 : f32
    %18 = vector.broadcast %cst_9 : f32 to vector<1x256xf32>
    %19 = arith.addf %17, %18 : vector<1x256xf32>
    %20 = math.rsqrt %19 : vector<1x256xf32>
    %21 = arith.mulf %5, %20 : vector<1x256xf32>
    %22 = vector.broadcast %21 : vector<1x256xf32> to vector<16x256xf32>
    %23 = arith.mulf %12, %22 : vector<16x256xf32>
    %24 = vector.broadcast %6 : vector<1x256xf32> to vector<16x256xf32>
    %25 = arith.addf %23, %24 : vector<16x256xf32>
    %cst_10 = arith.constant 2.000000e-01 : f32
    %26 = vector.broadcast %cst_10 : f32 to vector<16x256xf32>
    %27 = arith.mulf %26, %25 : vector<16x256xf32>
    %28 = arith.maximumf %25, %27 : vector<16x256xf32>
    %29 = arith.truncf %28 : vector<16x256xf32> to vector<16x256xbf16>
    %c0_11 = arith.constant 0 : index
    %c0_12 = arith.constant 0 : index
    %30 = vector.load %arg2[%c0_11, %c0_12] : memref<256x128xbf16, #tpu.memory_space<vmem>>, vector<256x128xbf16>
    %cst_13 = arith.constant dense<0.000000e+00> : vector<16x128xf32>
    %31 = tpu.matmul %29, %30, %cst_13 {dimension_numbers = #tpu.dot_dimension_numbers<[1], [0], [0], [1], [0, 0, 1, 1], [], []>} : vector<16x256xbf16>, vector<256x128xbf16>, vector<16x128xf32> -> vector<16x128xf32>
    %32 = vector.extract_strided_slice %0 {offsets = [2, 0], sizes = [1, 128], strides = [1, 1]} : vector<8x256xf32> to vector<1x128xf32>
    %33 = vector.extract_strided_slice %0 {offsets = [3, 0], sizes = [1, 128], strides = [1, 1]} : vector<8x256xf32> to vector<1x128xf32>
    %cst_14 = arith.constant dense<0.000000e+00> : vector<128xf32>
    %34 = vector.multi_reduction <add>, %31, %cst_14 [0] : vector<16x128xf32> to vector<128xf32>
    %35 = vector.shape_cast %34 : vector<128xf32> to vector<1x128xf32>
    %cst_15 = arith.constant 1.600000e+01 : f32
    %36 = vector.broadcast %cst_15 : f32 to vector<1x128xf32>
    %37 = arith.divf %35, %36 : vector<1x128xf32>
    %38 = vector.broadcast %37 : vector<1x128xf32> to vector<16x128xf32>
    %39 = arith.subf %31, %38 : vector<16x128xf32>
    %40 = arith.mulf %39, %39 : vector<16x128xf32>
    %cst_16 = arith.constant dense<0.000000e+00> : vector<128xf32>
    %41 = vector.multi_reduction <add>, %40, %cst_16 [0] : vector<16x128xf32> to vector<128xf32>
    %42 = vector.shape_cast %41 : vector<128xf32> to vector<1x128xf32>
    %cst_17 = arith.constant 1.600000e+01 : f32
    %43 = vector.broadcast %cst_17 : f32 to vector<1x128xf32>
    %44 = arith.divf %42, %43 : vector<1x128xf32>
    %cst_18 = arith.constant 9.99999974E-6 : f32
    %45 = vector.broadcast %cst_18 : f32 to vector<1x128xf32>
    %46 = arith.addf %44, %45 : vector<1x128xf32>
    %47 = math.rsqrt %46 : vector<1x128xf32>
    %48 = arith.mulf %32, %47 : vector<1x128xf32>
    %49 = vector.broadcast %48 : vector<1x128xf32> to vector<16x128xf32>
    %50 = arith.mulf %39, %49 : vector<16x128xf32>
    %51 = vector.broadcast %33 : vector<1x128xf32> to vector<16x128xf32>
    %52 = arith.addf %50, %51 : vector<16x128xf32>
    %cst_19 = arith.constant 2.000000e-01 : f32
    %53 = vector.broadcast %cst_19 : f32 to vector<16x128xf32>
    %54 = arith.mulf %53, %52 : vector<16x128xf32>
    %55 = arith.maximumf %52, %54 : vector<16x128xf32>
    %56 = vector.extract_strided_slice %0 {offsets = [4, 0], sizes = [1, 128], strides = [1, 1]} : vector<8x256xf32> to vector<1x128xf32>
    %57 = vector.broadcast %56 : vector<1x128xf32> to vector<16x128xf32>
    %58 = arith.mulf %55, %57 : vector<16x128xf32>
    %cst_20 = arith.constant dense<0.000000e+00> : vector<16xf32>
    %59 = vector.multi_reduction <add>, %58, %cst_20 [1] : vector<16x128xf32> to vector<16xf32>
    %60 = vector.shape_cast %59 : vector<16xf32> to vector<16x1xf32>
    %61 = vector.extract_strided_slice %0 {offsets = [5, 0], sizes = [1, 1], strides = [1, 1]} : vector<8x256xf32> to vector<1x1xf32>
    %62 = vector.broadcast %61 : vector<1x1xf32> to vector<16x1xf32>
    %63 = arith.addf %60, %62 : vector<16x1xf32>
    %64 = arith.negf %63 : vector<16x1xf32>
    %65 = math.exp %64 : vector<16x1xf32>
    %cst_21 = arith.constant 1.000000e+00 : f32
    %66 = vector.broadcast %cst_21 : f32 to vector<16x1xf32>
    %67 = arith.addf %66, %65 : vector<16x1xf32>
    %68 = arith.divf %66, %67 : vector<16x1xf32>
    %c0_22 = arith.constant 0 : index
    %c0_23 = arith.constant 0 : index
    %69 = vector.load %arg4[%c0_22, %c0_23] : memref<16x1xf32, #tpu.memory_space<vmem>>, vector<16x1xf32>
    tpu.vector_store %arg4[%c0_22, %c0_23], %68 {strides = array<i32>} : memref<16x1xf32, #tpu.memory_space<vmem>>, vector<16x1xf32>,
    return
  }
}

</mosaic_0001>

<bundles_post_ra>
// kernel: tpu_custom_call.1
= control target key start
LH: loop header
LB: loop body
LE: loop exit
PB: predicated region body
PF: predicated region fallthrough
CT: control target
= control target key end

     0   :  { %9 = vsyncpa [#allocation3], 0  ;;  %s810_s0 = inlined_call_operand.hbm [shape: f32[16,32], index: 0, kind: input, shape index: {}]   ;;  %s811_s1 = inlined_call_operand.hbm [shape: bf16[32,256], index: 1, kind: input, shape index: {}]   ;;  %s812_s2 = inlined_call_operand.hbm [shape: bf16[256,128], index: 2, kind: input, shape index: {}]   ;;  %s813_s3 = inlined_call_operand.hbm [shape: f32[8,256], index: 3, kind: input, shape index: {}]   ;;  %s814_s4 = inlined_call_operand.vmem [shape: f32[16,1], index: 4, kind: output, shape index: {}]  }
   0x1   :  { %10 = vsyncpa [#allocation5], 0 }
   0x2   :  { %11 = vsyncpa [#allocation8], 0  ;;  %s29_s17 = sshll.u32 %s811_s1, 4  ;;  %s720_s18 = smov [#allocation4]   ;;  %s30_s17 = int_to_ptr.hbm [resolvable:$true] %s29_s17 }
   0x3   :  { %s31_s19 = sshll.u32 %s720_s18, 4  ;;  %s16_s22 = sshll.u32 %s810_s0, 4  ;;  %s32_s19 = int_to_ptr.vmem [resolvable:$true] %s31_s19  ;;  %s17_s22 = int_to_ptr.hbm [resolvable:$true] %s16_s22 }
   0x4   :  { %s721_s23 = smov 128   ;;  %s722_s24 = smov 8  }
   0x5   :  { %37 = dma.hbm_to_vmem [thread:$0]  %s30_s17, 512, %s32_s19, [#allocation5], %s721_s23, %s721_s23, %s722_s24  }
   0x6   :  { %s723_s25 = smov [#allocation2]   ;;  %s42_s29 = sshll.u32 %s812_s2, 4  ;;  %s43_s29 = int_to_ptr.hbm [resolvable:$true] %s42_s29 }
   0x7   :  { %s18_s26 = sshll.u32 %s723_s25, 4  ;;  %s724_s1 = smov [#allocation6]   ;;  %s19_s26 = int_to_ptr.vmem [resolvable:$true] %s18_s26 }
   0x8   :  { %24 = dma.hbm_to_vmem [thread:$0]  %s17_s22, 256, %s19_s26, [#allocation3], %s721_s23, %s721_s23, %s722_s24  }
   0x9   :  { %s44_s30 = sshll.u32 %s724_s1, 4  ;;  %s56_s0 = sshll.u32 %s813_s3, 4  ;;  %s45_s30 = int_to_ptr.vmem [resolvable:$true] %s44_s30  ;;  %s57_s0 = int_to_ptr.hbm [resolvable:$true] %s56_s0 }
   0xa   :  { %s725_s7 = smov 64   ;;  %s726_s8 = smov 4  }
   0xb   :  { %50 = dma.hbm_to_vmem [thread:$0]  %s43_s29, 2048, %s45_s30, [#allocation5], %s725_s7, %s725_s7, %s726_s8  }
   0xc   :  { %s727_s9 = smov [#allocation7]  }
   0xd   :  { %s58_s10 = sshll.u32 %s727_s9, 4  ;;  %s59_s10 = int_to_ptr.vmem [resolvable:$true] %s58_s10 }
   0xe   :  { %61 = dma.hbm_to_vmem [thread:$0]  %s57_s0, 256, %s59_s10, [#allocation8]  }
   0xf   :  { %714 = dma.done.wait [#allocation3], 256  }
  0x10   :  { %715 = vsyncadd [#allocation3], 4294967040 }
  0x11   :  { %716 = dma.done.wait [#allocation5], 2560  }
  0x12   :  { %717 = vsyncadd [#allocation5], 4294964736 }
  0x13   :  { %718 = dma.done.wait [#allocation8], 256  }
  0x14   :  { %719 = vsyncadd [#allocation8], 4294967040  ;;  %v499_v0 = vld [vmem:[#allocation4 + $0x10] sm:$0xf]  ;;  %v576_v1 = vld [vmem:[#allocation4 + $0x14] sm:$0xf0] }
  0x15   :  { %v575_v2 = vld [vmem:[#allocation4 + $0x14] sm:$0xf]  ;;  %v500_v3 = vor.u32 %v576_v1, %v499_v0  ;;  %v501_v4 = vld [vmem:[#allocation4 + $0x18] sm:$0xf0]  ;;  %v491_v5 = vld [vmem:[#allocation4] sm:$0xf] }
  0x16   :  { %v574_v6 = vld [vmem:[#allocation4 + $0x4] sm:$0xf0]  ;;  %v504_v7 = vor.u32 %v575_v2, %v501_v4  ;;  %v573_v8 = vld [vmem:[#allocation4 + $0x4] sm:$0xf]  ;;  %v493_v9 = vld [vmem:[#allocation4 + $0x8] sm:$0xf0] }
  0x17   :  { %118 = vmatpush.bf16.msra.mxu0 %v500_v3  ;;  %v492_v10 = vor.u32 %v574_v6, %v491_v5  ;;  %v81_v11 = vld [vmem:[#allocation2] sm:$0xff]  ;;  %v82_v12 = vld [vmem:[#allocation2 + $0x8] sm:$0xff]  ;;  %v496_v13 = vor.u32 %v573_v8, %v493_v9  ;;  %vm108_vm0 = vcmask 261120   ;;  %v728_v15 = vmov 16.0   ;;  %v582_v45 = vld [vmem:[#allocation6 + $0x28] sm:$0xff] }
  0x18   :  { %132 = vmatpush.bf16.msra.mxu1 %v504_v7  ;;  %v83_v14 = vpack.c.bf16 %v82_v12, %v81_v11  ;;  %602 = vrcp.f32 %v728_v15  ;;  %v584_v31 = vld [vmem:[#allocation6 + $0x38] sm:$0xff]  ;;  %v583_v38 = vld [vmem:[#allocation6 + $0x30] sm:$0xff]  ;;  %v590_v46 = vld [vmem:[#allocation6 + $0x68] sm:$0xff]  ;;  %vm479_vm13 = vcmask 7168  }
  0x19   :  { %v592_v32 = vld [vmem:[#allocation6 + $0x78] sm:$0xff]  ;;  %361 = vmatpush.bf16.msra.mxu2 %v584_v31  ;;  %v591_v39 = vld [vmem:[#allocation6 + $0x70] sm:$0xff]  ;;  %v581_v54 = vld [vmem:[#allocation6 + $0x20] sm:$0xff] }
  0x1a   :  { %375 = vmatpush.bf16.msra.mxu3 %v592_v32  ;;  %v589_v55 = vld [vmem:[#allocation6 + $0x60] sm:$0xff]  ;;  %v580_v61 = vld [vmem:[#allocation6 + $0x18] sm:$0xff]  ;;  %v579_v3 = vld [vmem:[#allocation6 + $0x10] sm:$0xff] }
  0x1b   :  { %119 = vmatpush.bf16.msra.mxu0 %v492_v10  ;;  %v588_v62 = vld [vmem:[#allocation6 + $0x58] sm:$0xff]  ;;  %v587_v4 = vld [vmem:[#allocation6 + $0x50] sm:$0xff]  ;;  %v578_v9 = vld [vmem:[#allocation6 + $0x8] sm:$0xff] }
  0x1c   :  { %133 = vmatpush.bf16.msra.mxu1 %v496_v13  ;;  %v586_v10 = vld [vmem:[#allocation6 + $0x48] sm:$0xff]  ;;  %v577_v13 = vld [vmem:[#allocation6] sm:$0xff] }
  0x1d   :  { %362 = vmatpush.bf16.msra.mxu2 %v583_v38  ;;  %v80_v32 = vld [vmem:[#allocation7 + $0x8] sm:$0xff] }
  0x1e   :  { %505 = vmatmul.msk.bf16.vlgmr.msra.gmra.mxu0 %vm108_vm0, %v83_v14  ;;  %v603_v17 = vpop.eup %602  ;;  %376 = vmatpush.bf16.msra.mxu3 %v591_v39 }
  0x1f   :  { %506 = vmatmul.msk.bf16.vlgmr.msra.gmra.mxu1 %vm108_vm0, %v83_v14  ;;  %v155_v19 = vmul.f32 16.0, %v603_v17  ;;  %vm159_vm1 = vweird.f32 %v603_v17  ;;  %v585_v14 = vld [vmem:[#allocation6 + $0x40] sm:$0xff] }
  0x21   :  { %v156_v21 = vsub.f32 1.0, %v155_v19  ;;  %363 = vmatpush.bf16.msra.mxu2 %v582_v45 }
  0x22   :  { %377 = vmatpush.bf16.msra.mxu3 %v590_v46 }
  0x23   :  { %v157_v26 = vmul.f32 %v603_v17, %v156_v21 }
  0x25   :  { %v158_v33 = vadd.f32 %v603_v17, %v157_v26  ;;  %364 = vmatpush.bf16.msra.mxu2 %v581_v54 }
  0x26   :  { %378 = vmatpush.bf16.msra.mxu3 %v589_v55 }
  0x27   :  { %v766_v40 = vsel %vm159_vm1, %v603_v17, %v158_v33 }
  0x29   :  { %365 = vmatpush.bf16.msra.mxu2 %v580_v61 }
  0x2a   :  { %379 = vmatpush.bf16.msra.mxu3 %v588_v62 }
  0x2d   :  { %366 = vmatpush.bf16.msra.mxu2 %v579_v3 }
  0x2e   :  { %380 = vmatpush.bf16.msra.mxu3 %v587_v4 }
  0x31   :  { %367 = vmatpush.bf16.msra.mxu2 %v578_v9 }
  0x32   :  { %381 = vmatpush.bf16.msra.mxu3 %v586_v10 }
  0x35   :  { %368 = vmatpush.bf16.msra.mxu2 %v577_v13 }
  0x36   :  { %382 = vmatpush.bf16.msra.mxu3 %v585_v14 }
  0x9b   :  { %v121_v16 = vpop.f32.mrf.mxu0 }
  0x9c   :  { %v135_v18 = vpop.f32.mrf.mxu1 }
  0xa3   :  { %v123_v20 = vpop.f32.mrf.mxu0 }
  0xa4   :  { %v140_v22 = vadd.f32 %v123_v20, %v121_v16  ;;  %v137_v23 = vpop.f32.mrf.mxu1 }
  0xa5   :  { %v147_v24 = vadd.f32 %v137_v23, %v135_v18 }
  0xa6   :  { %v141_v25 = vrot.slane %v140_v22, 4 }
  0xa7   :  { %v148_v27 = vrot.slane %v147_v24, 4 }
  0xa8   :  { %v142_v28 = vadd.f32 %v141_v25, %v140_v22 }
  0xa9   :  { %v149_v29 = vadd.f32 %v148_v27, %v147_v24 }
  0xaa   :  { %v143_v30 = vrot.slane %v142_v28, 2 }
  0xab   :  { %v150_v34 = vrot.slane %v149_v29, 2 }
  0xac   :  { %v144_v35 = vadd.f32 %v143_v30, %v142_v28  ;;  %v788_v30 = vld [vmem:[#allocation7] sm:$0xff] }
  0xad   :  { %v151_v36 = vadd.f32 %v150_v34, %v149_v29  ;;  %v217_v39 = vperm.slane %v788_v30, 1 }
  0xae   :  { %v145_v37 = vrot.slane %v144_v35, 1 }
  0xaf   :  { %v152_v41 = vrot.slane %v151_v36, 1 }
  0xb0   :  { %v146_v42 = vadd.f32 %v145_v37, %v144_v35 }
  0xb1   :  { %v153_v43 = vadd.f32 %v152_v41, %v151_v36 }
  0xb2   :  { %v161_v44 = vmul.f32 %v766_v40, %v146_v42  ;;  %v218_v42 = vperm.slane %v80_v32, 1 }
  0xb3   :  { %v162_v47 = vmul.f32 %v766_v40, %v153_v43 }
  0xb4   :  { %v770_v48 = vsub.f32 %v121_v16, %v161_v44  ;;  %v772_v49 = vsub.f32 %v123_v20, %v161_v44 }
  0xb5   :  { %v774_v50 = vsub.f32 %v135_v18, %v162_v47  ;;  %v776_v51 = vsub.f32 %v137_v23, %v162_v47 }
  0xb6   :  { %v167_v52 = vmul.f32 %v770_v48, %v770_v48  ;;  %v169_v53 = vmul.f32 %v772_v49, %v772_v49 }
  0xb7   :  { %v168_v56 = vmul.f32 %v774_v50, %v774_v50  ;;  %v170_v57 = vmul.f32 %v776_v51, %v776_v51 }
  0xb8   :  { %v171_v58 = vadd.f32 %v169_v53, %v167_v52 }
  0xb9   :  { %v178_v59 = vadd.f32 %v170_v57, %v168_v56 }
  0xba   :  { %v172_v60 = vrot.slane %v171_v58, 4 }
  0xbb   :  { %v179_v63 = vrot.slane %v178_v59, 4 }
  0xbc   :  { %v173_v0 = vadd.f32 %v172_v60, %v171_v58 }
  0xbd   :  { %v180_v1 = vadd.f32 %v179_v63, %v178_v59 }
  0xbe   :  { %v174_v2 = vrot.slane %v173_v0, 2 }
  0xbf   :  { %v181_v5 = vrot.slane %v180_v1, 2 }
  0xc0   :  { %v175_v6 = vadd.f32 %v174_v2, %v173_v0 }
  0xc1   :  { %v182_v7 = vadd.f32 %v181_v5, %v180_v1 }
  0xc2   :  { %v176_v8 = vrot.slane %v175_v6, 1 }
  0xc3   :  { %v183_v11 = vrot.slane %v182_v7, 1 }
  0xc4   :  { %v177_v12 = vadd.f32 %v176_v8, %v175_v6 }
  0xc5   :  { %v184_v15 = vadd.f32 %v183_v11, %v182_v7 }
  0xc6   :  { %v185_v16 = vmul.f32 %v177_v12, %v766_v40 }
  0xc7   :  { %v186_v17 = vmul.f32 %v184_v15, %v766_v40 }
  0xc8   :  { %v187_v18 = vadd.f32 1e-05, %v185_v16 }
  0xc9   :  { %v188_v19 = vadd.f32 1e-05, %v186_v17 }
  0xca   :  { %604 = vrsqrt.f32 %v187_v18  ;;  %vm195_vm4 = vweird.f32 %v187_v18 }
  0xcb   :  { %606 = vrsqrt.f32 %v188_v19  ;;  %vm205_vm6 = vweird.f32 %v188_v19 }
  0xd0   :  { %v605_v20 = vpop.eup %604 }
  0xd1   :  { %v607_v21 = vpop.eup %606  ;;  %v190_v22 = vmul.f32 %v605_v20, %v187_v18  ;;  %vm196_vm2 = vweird.f32 %v605_v20 }
  0xd2   :  { %v200_v23 = vmul.f32 %v607_v21, %v188_v19  ;;  %vm206_vm3 = vweird.f32 %v607_v21  ;;  %vm197_vm5 = vmor %vm195_vm4, %vm196_vm2 }
  0xd3   :  { %v191_v24 = vmul.f32 %v605_v20, %v190_v22  ;;  %vm207_vm7 = vmor %vm205_vm6, %vm206_vm3 }
  0xd4   :  { %v201_v25 = vmul.f32 %v607_v21, %v200_v23 }
  0xd5   :  { %v192_v26 = vmul.f32 0.5, %v191_v24 }
  0xd6   :  { %v202_v27 = vmul.f32 0.5, %v201_v25 }
  0xd7   :  { %v193_v28 = vsub.f32 1.5, %v192_v26 }
  0xd8   :  { %v203_v29 = vsub.f32 1.5, %v202_v27 }
  0xd9   :  { %v194_v31 = vmul.f32 %v605_v20, %v193_v28 }
  0xda   :  { %v204_v33 = vmul.f32 %v607_v21, %v203_v29 }
  0xdb   :  { %v198_v34 = vsel %vm197_vm5, %v605_v20, %v194_v31 }
  0xdc   :  { %v209_v35 = vmul.f32 %v198_v34, %v788_v30  ;;  %v208_v36 = vsel %vm207_vm7, %v607_v21, %v204_v33  ;;  %v424_v34 = vperm.slane %v788_v30, 3 }
  0xdd   :  { %v210_v37 = vmul.f32 %v208_v36, %v80_v32 }
  0xde   :  { %v211_v38 = vperm.slane %v209_v35, 0 }
  0xdf   :  { %v212_v41 = vperm.slane %v210_v37, 0 }
  0xe0   :  { %v213_v43 = vmul.f32 %v211_v38, %v770_v48  ;;  %v215_v44 = vmul.f32 %v211_v38, %v772_v49  ;;  %v431_v38 = vperm.slane %v788_v30, 4 }
  0xe1   :  { %v214_v45 = vmul.f32 %v212_v41, %v774_v50  ;;  %v216_v46 = vmul.f32 %v212_v41, %v776_v51 }
  0xe2   :  { %v221_v47 = vadd.f32 %v217_v39, %v215_v44  ;;  %v219_v52 = vadd.f32 %v217_v39, %v213_v43 }
  0xe3   :  { %v222_v53 = vadd.f32 %v218_v42, %v216_v46  ;;  %v220_v54 = vadd.f32 %v218_v42, %v214_v45  ;;  %v438_v46 = vperm.slane %v788_v30, 5 }
  0xe4   :  { %v223_v55 = vmul.f32 0.2, %v219_v52  ;;  %v225_v56 = vmul.f32 0.2, %v221_v47 }
  0xe5   :  { %v224_v57 = vmul.f32 0.2, %v220_v54  ;;  %v226_v58 = vmul.f32 0.2, %v222_v53 }
  0xe6   :  { %v227_v59 = vmax.f32 %v219_v52, %v223_v55  ;;  %v229_v60 = vmax.f32 %v221_v47, %v225_v56 }
  0xe7   :  { %v228_v61 = vmax.f32 %v220_v54, %v224_v57  ;;  %v230_v62 = vmax.f32 %v222_v53, %v226_v58 }
  0xe8   :  { %v231_v63 = vpack.c.bf16 %v229_v60, %v227_v59 }
  0xe9   :  { %v232_v48 = vpack.c.bf16 %v230_v62, %v228_v61 }
  0xea   :  { %369 = vmatmul.bf16.vlgmr.msra.gmra.mxu2 %v231_v63 }
  0xeb   :  { %383 = vmatmul.bf16.vlgmr.msra.gmra.mxu3 %v232_v48 }
 0x16d   :  { %v370_v49 = vpop.f32.mrf.mxu2 }
 0x16e   :  { %v384_v50 = vpop.f32.mrf.mxu3 }
 0x16f   :  { %v385_v1 = vadd.f32 %v384_v50, %v370_v49 }
 0x175   :  { %v372_v0 = vpop.f32.mrf.mxu2 }
 0x176   :  { %v386_v51 = vpop.f32.mrf.mxu3 }
 0x177   :  { %v387_v2 = vadd.f32 %v386_v51, %v372_v0 }
 0x179   :  { %v389_v3 = vadd.f32 %v387_v2, %v385_v1 }
 0x17b   :  { %v390_v4 = vrot.slane %v389_v3, 4 }
 0x17d   :  { %v391_v5 = vadd.f32 %v390_v4, %v389_v3 }
 0x17f   :  { %v392_v6 = vrot.slane %v391_v5, 2 }
 0x181   :  { %v393_v7 = vadd.f32 %v392_v6, %v391_v5 }
 0x183   :  { %v394_v8 = vrot.slane %v393_v7, 1 }
 0x185   :  { %v395_v9 = vadd.f32 %v394_v8, %v393_v7 }
 0x187   :  { %v396_v10 = vmul.f32 %v395_v9, %v766_v40 }
 0x189   :  { %v397_v11 = vsub.f32 %v385_v1, %v396_v10  ;;  %v398_v12 = vsub.f32 %v387_v2, %v396_v10 }
 0x18b   :  { %v399_v13 = vmul.f32 %v397_v11, %v397_v11  ;;  %v400_v14 = vmul.f32 %v398_v12, %v398_v12 }
 0x18d   :  { %v401_v15 = vadd.f32 %v400_v14, %v399_v13 }
 0x18f   :  { %v402_v16 = vrot.slane %v401_v15, 4 }
 0x191   :  { %v403_v17 = vadd.f32 %v402_v16, %v401_v15 }
 0x193   :  { %v404_v18 = vrot.slane %v403_v17, 2 }
 0x195   :  { %v405_v19 = vadd.f32 %v404_v18, %v403_v17 }
 0x197   :  { %v406_v20 = vrot.slane %v405_v19, 1 }
 0x199   :  { %v407_v21 = vadd.f32 %v406_v20, %v405_v19 }
 0x19b   :  { %v408_v22 = vmul.f32 %v407_v21, %v766_v40 }
 0x19d   :  { %v409_v23 = vadd.f32 1e-05, %v408_v22 }
 0x19f   :  { %608 = vrsqrt.f32 %v409_v23  ;;  %vm416_vm9 = vweird.f32 %v409_v23 }
 0x1a5   :  { %v609_v24 = vpop.eup %608 }
 0x1a6   :  { %v411_v25 = vmul.f32 %v609_v24, %v409_v23  ;;  %vm417_vm8 = vweird.f32 %v609_v24 }
 0x1a7   :  { %vm418_vm10 = vmor %vm416_vm9, %vm417_vm8 }
 0x1a8   :  { %v412_v26 = vmul.f32 %v609_v24, %v411_v25 }
 0x1aa   :  { %v413_v27 = vmul.f32 0.5, %v412_v26 }
 0x1ac   :  { %v414_v28 = vsub.f32 1.5, %v413_v27 }
 0x1ae   :  { %v415_v29 = vmul.f32 %v609_v24, %v414_v28 }
 0x1b0   :  { %v419_v31 = vsel %vm418_vm10, %v609_v24, %v415_v29 }
 0x1b1   :  { %v420_v32 = vmul.f32 %v419_v31, %v788_v30 }
 0x1b3   :  { %v421_v33 = vperm.slane %v420_v32, 2 }
 0x1b5   :  { %v423_v35 = vmul.f32 %v421_v33, %v398_v12  ;;  %v422_v36 = vmul.f32 %v421_v33, %v397_v11 }
 0x1b7   :  { %v425_v40 = vadd.f32 %v424_v34, %v422_v36  ;;  %v426_v39 = vadd.f32 %v424_v34, %v423_v35 }
 0x1b9   :  { %v427_v37 = vmul.f32 0.2, %v425_v40  ;;  %v428_v43 = vmul.f32 0.2, %v426_v39 }
 0x1bb   :  { %v429_v41 = vmax.f32 %v425_v40, %v427_v37  ;;  %v430_v44 = vmax.f32 %v426_v39, %v428_v43 }
 0x1bd   :  { %v432_v42 = vmul.f32 %v431_v38, %v429_v41  ;;  %v433_v45 = vmul.f32 %v431_v38, %v430_v44 }
 0x1bf   :  { %434 = vadd.xlane.f32.xlu0 %v432_v42 }
 0x1c7   :  { %436 = vadd.xlane.f32.xlu0 %v433_v45 }
 0x232   :  { %v435_v47 = vpop.xlane.xlu0 %434 }
 0x233   :  { %v439_v52 = vadd.f32 %v438_v46, %v435_v47 }
 0x235   :  { %v571_v53 = vmul.f32 -1.442695, %v439_v52 }
 0x237   :  { %610 = vpow2.f32 %v571_v53 }
 0x23a   :  { %v437_v54 = vpop.xlane.xlu0 %436 }
 0x23b   :  { %v440_v55 = vadd.f32 %v438_v46, %v437_v54 }
 0x23d   :  { %v611_v56 = vpop.eup %610  ;;  %v572_v57 = vmul.f32 -1.442695, %v440_v55 }
 0x23e   :  { %v447_v58 = vadd.f32 1.0, %v611_v56 }
 0x23f   :  { %612 = vpow2.f32 %v572_v57 }
 0x240   :  { %614 = vrcp.f32 %v447_v58  ;;  %v460_v48 = vand.u32 2147483648, %v447_v58  ;;  %v458_v30 = vand.u32 2147483647, %v447_v58  ;;  %vm454_vm12 = vweird.f32 %v447_v58 }
 0x242   :  { %v461_v51 = vor.u32 1.1754944e-38, %v460_v48  ;;  %vm459_vm15 = vcmp.eq.f32.partialorder %v458_v30, 8.507059e+37 }
 0x245   :  { %v613_v59 = vpop.eup %612 }
 0x246   :  { %v615_v60 = vpop.eup %614  ;;  %v448_v61 = vadd.f32 1.0, %v613_v59 }
 0x247   :  { %v450_v62 = vmul.f32 %v615_v60, %v447_v58  ;;  %vm455_vm11 = vweird.f32 %v615_v60 }
 0x248   :  { %616 = vrcp.f32 %v448_v61  ;;  %vm456_vm14 = vmor %vm454_vm12, %vm455_vm11  ;;  %v475_v5 = vand.u32 2147483648, %v448_v61  ;;  %v473_v7 = vand.u32 2147483647, %v448_v61  ;;  %vm469_vm1 = vweird.f32 %v448_v61 }
 0x249   :  { %v451_v63 = vsub.f32 1.0, %v450_v62 }
 0x24a   :  { %v476_v9 = vor.u32 1.1754944e-38, %v475_v5  ;;  %vm474_vm3 = vcmp.eq.f32.partialorder %v473_v7, 8.507059e+37 }
 0x24b   :  { %v452_v49 = vmul.f32 %v615_v60, %v451_v63 }
 0x24d   :  { %v453_v50 = vadd.f32 %v615_v60, %v452_v49 }
 0x24e   :  { %v617_v0 = vpop.eup %616 }
 0x24f   :  { %v457_v1 = vsel %vm456_vm14, %v615_v60, %v453_v50  ;;  %v465_v2 = vmul.f32 %v617_v0, %v448_v61  ;;  %vm470_vm0 = vweird.f32 %v617_v0 }
 0x250   :  { %v462_v3 = vsel %vm459_vm15, %v461_v51, %v457_v1  ;;  %vm471_vm2 = vmor %vm469_vm1, %vm470_vm0 }
 0x251   :  { %480 = vst.msk [vmem:[%s814_s4] sm:$0xff] %vm479_vm13, %v462_v3  ;;  %v466_v4 = vsub.f32 1.0, %v465_v2 }
 0x253   :  { %v467_v6 = vmul.f32 %v617_v0, %v466_v4 }
 0x255   :  { %v468_v8 = vadd.f32 %v617_v0, %v467_v6 }
 0x257   :  { %v472_v10 = vsel %vm471_vm2, %v617_v0, %v468_v8 }
 0x258   :  { %v477_v11 = vsel %vm474_vm3, %v476_v9, %v472_v10 }
 0x259   :  { %481 = vst.msk [vmem:[%s814_s4 + $0x8] sm:$0xff] %vm479_vm13, %v477_v11 }
 0x25a   :  { %486 = vsyncpa [#allocation3], 1 }
 0x25b   :  { %487 = vsyncpa [#allocation5], 1 }
 0x25c   :  { %488 = vsyncpa [#allocation8], 1 }

</bundles_post_ra>
